<compile_context>
chip_gen: v5e
topology: v5e:2x2
jax: 0.10.0
libtpu: 0.0.40
codegen_flags: <defaults>
</compile_context>

<pallas_src>
import functools

import jax
import jax.numpy as jnp
from jax.experimental import pallas as pl
from jax.experimental.pallas import tpu as pltpu

_LANES = 128
_SUBLANES = 8
_NUM_CORES = 2  # reduction split for v7x megacore; no-op on 1-TC chips


def _mrl_kernel(x_ref, y_ref, l_ref, o_ref, *, margin, row_tile, n_rows,
                steps_per_core, needs_mask):
    c = pl.program_id(0)   # core-split axis ("parallel")
    i = pl.program_id(1)   # reduction axis ("arbitrary")

    # The (1, 8, 128) output block is the per-core accumulator (same block
    # index for every i -> stays resident in VMEM across the reduction).
    @pl.when(i == 0)
    def _():
        o_ref[...] = jnp.zeros_like(o_ref)

    # Cast inside the kernel so HBM traffic stays in the caller's dtype.
    x = x_ref[...].astype(jnp.float32)
    y = y_ref[...].astype(jnp.float32)
    lab = l_ref[...].astype(jnp.float32)
    # NOTE: matches the reference module: relu(-labels*(x-y) - margin)
    # (this intentionally differs from torch.nn.MarginRankingLoss's "+margin").
    losses = jnp.maximum(-lab * (x - y) - margin, 0.0)

    if needs_mask:
        # Logical (un-clamped) block index; zero out rows past the real array
        # (covers the partial last block and duplicated overhang blocks where
        # the index_map clamp re-reads the final block).  VPU work only --
        # free slack in a memory-bound kernel.
        row_base = (c * steps_per_core + i) * row_tile
        rows = row_base + jax.lax.broadcasted_iota(jnp.int32, losses.shape, 0)
        losses = jnp.where(rows < n_rows, losses, 0.0)

    # vreg-shaped accumulation: sublane-aligned VPU adds only; the single
    # expensive cross-lane reduce happens exactly once, in the wrapper.
    partial = jnp.sum(
        losses.reshape(row_tile // _SUBLANES, _SUBLANES, _LANES), axis=0)
    o_ref[...] += partial.reshape(1, _SUBLANES, _LANES)


def margin_ranking_loss(x, y, labels, *, margin=0.0, aggregation="reduce_mean",
                        row_tile=2048):
    assert margin >= 0.0, "Margin should be non-negative"
    assert aggregation in ("reduce_mean", "reduce_sum")

    total = x.size

    # Flatten to lane-aligned (N, 128); zero-pad the tail to a multiple of
    # 8*128.  Zero padding is loss-neutral: relu(-0*(0-0) - margin) == 0 since
    # margin >= 0.  No dtype cast here -- that is done in-kernel.
    def _prep(a):
        flat = a.reshape(-1)
        pad = (-total) % (_SUBLANES * _LANES)
        if pad:
            flat = jnp.pad(flat, (0, pad))
        return flat.reshape(-1, _LANES)

    x2, y2, l2 = _prep(x), _prep(y), _prep(labels)
    n_rows = x2.shape[0]                                   # multiple of 8

    # Clamp the tile to the problem size and keep it sublane-aligned.
    row_tile = max(_SUBLANES, min(int(row_tile), n_rows))
    row_tile -= row_tile % _SUBLANES
    blocks = pl.cdiv(n_rows, row_tile)
    steps_per_core = pl.cdiv(blocks, _NUM_CORES)
    needs_mask = (n_rows % row_tile != 0) or (
        steps_per_core * _NUM_CORES != blocks)

    def in_map(c, i):
        # Clamp so the DMA never walks past the array; masked in-kernel.
        return (jnp.minimum(c * steps_per_core + i, blocks - 1), 0)

    kernel = functools.partial(
        _mrl_kernel,
        margin=float(margin),
        row_tile=row_tile,
        n_rows=n_rows,
        steps_per_core=steps_per_core,
        needs_mask=needs_mask,
    )

    in_spec = pl.BlockSpec((row_tile, _LANES), in_map)
    partials = pl.pallas_call(
        kernel,
        out_shape=jax.ShapeDtypeStruct((_NUM_CORES, _SUBLANES, _LANES),
                                       jnp.float32),
        grid_spec=pltpu.PrefetchScalarGridSpec(
            num_scalar_prefetch=0,
            grid=(_NUM_CORES, steps_per_core),
            in_specs=[in_spec, in_spec, in_spec],
            out_specs=pl.BlockSpec((1, _SUBLANES, _LANES),
                                   lambda c, i: (c, 0, 0)),
        ),
        compiler_params=pltpu.CompilerParams(
            dimension_semantics=("parallel", "arbitrary"),
            vmem_limit_bytes=32 * 1024 * 1024,
        ),
    )(x2, y2, l2)

    total_sum = jnp.sum(partials)           # single cheap final reduce in XLA
    if aggregation == "reduce_mean":
        return total_sum / jnp.float32(total)
    return total_sum


def _reference(x, y, labels, margin, aggregation):
    losses = jnp.maximum(
        -labels.astype(jnp.float32)
        * (x.astype(jnp.float32) - y.astype(jnp.float32)) - margin, 0.0)
    return losses.mean() if aggregation == "reduce_mean" else losses.sum()


if __name__ == "__main__":
    key = jax.random.PRNGKey(0)

    ok = True
    # Lane-aligned, ragged, and bf16 cases (exercise pad + mask + cast paths).
    cases = (
        ((2, 4, 16, 16), 0.1, jnp.float32),
        ((3, 5, 7), 0.25, jnp.float32),
        ((2, 4, 16, 16), 0.05, jnp.bfloat16),
    )
    for shape, margin, dtype in cases:
        kx, ky, kl, key = jax.random.split(key, 4)
        x = jax.random.normal(kx, shape, dtype=jnp.float32).astype(dtype)
        y = jax.random.normal(ky, shape, dtype=jnp.float32).astype(dtype)
        labels = jnp.where(jax.random.bernoulli(kl, 0.5, shape),
                           1.0, -1.0).astype(dtype)
        for agg in ("reduce_mean", "reduce_sum"):
            out = margin_ranking_loss(x, y, labels, margin=margin,
                                      aggregation=agg)
            out = jax.block_until_ready(out)
            ref = _reference(x, y, labels, margin, agg)
            tol = 1e-5 if dtype == jnp.float32 else 2e-2
            if not jnp.allclose(out, ref, rtol=tol, atol=tol):
                ok = False
                print("MISMATCH", shape, agg, str(dtype), float(out),
                      float(ref))

    if ok:
        print("KERNEL_OK")
</pallas_src>

<mosaic_0001>
module attributes {stable_mosaic.version = 11 : i64} {
  func.func @_mrl_kernel(%arg0: i32, %arg1: i32, %arg2: memref<16x128xf32, #tpu.memory_space<vmem>>, %arg3: memref<16x128xf32, #tpu.memory_space<vmem>>, %arg4: memref<16x128xf32, #tpu.memory_space<vmem>>, %arg5: memref<1x8x128xf32, #tpu.memory_space<vmem>>) attributes {dimension_semantics = [#tpu.dimension_semantics<parallel>, #tpu.dimension_semantics<arbitrary>], iteration_bounds = array<i64: 2, 1>, scalar_prefetch = 0 : i64, scratch_operands = 0 : i64, tpu.core_type = #tpu.core_type<tc>, window_params = [{transform_indices = @transform_0, window_bounds = array<i64: 16, 128>}, {transform_indices = @transform_1, window_bounds = array<i64: 16, 128>}, {transform_indices = @transform_2, window_bounds = array<i64: 16, 128>}, {transform_indices = @transform_3, window_bounds = array<i64: 1, 8, 128>}]} {
    %c0_i32 = arith.constant 0 : i32
    %0 = arith.cmpi eq, %arg1, %c0_i32 : i32
    %1 = arith.extui %0 : i1 to i32
    %c0_i32_0 = arith.constant 0 : i32
    %2 = arith.cmpi ne, %1, %c0_i32_0 : i32
    scf.if %2 {
      %cst_17 = arith.constant 0.000000e+00 : f32
      %30 = vector.broadcast %cst_17 : f32 to vector<1x8x128xf32>
      %c0_18 = arith.constant 0 : index
      %c0_19 = arith.constant 0 : index
      %c0_20 = arith.constant 0 : index
      %31 = vector.load %arg5[%c0_18, %c0_19, %c0_20] : memref<1x8x128xf32, #tpu.memory_space<vmem>>, vector<1x8x128xf32>
      tpu.vector_store %arg5[%c0_18, %c0_19, %c0_20], %30 {strides = array<i32>} : memref<1x8x128xf32, #tpu.memory_space<vmem>>, vector<1x8x128xf32>,
    } else {
    }
    %c0 = arith.constant 0 : index
    %c0_1 = arith.constant 0 : index
    %3 = vector.load %arg2[%c0, %c0_1] : memref<16x128xf32, #tpu.memory_space<vmem>>, vector<16x128xf32>
    %c0_2 = arith.constant 0 : index
    %c0_3 = arith.constant 0 : index
    %4 = vector.load %arg3[%c0_2, %c0_3] : memref<16x128xf32, #tpu.memory_space<vmem>>, vector<16x128xf32>
    %c0_4 = arith.constant 0 : index
    %c0_5 = arith.constant 0 : index
    %5 = vector.load %arg4[%c0_4, %c0_5] : memref<16x128xf32, #tpu.memory_space<vmem>>, vector<16x128xf32>
    %cst = arith.constant 0.000000e+00 : f32
    %6 = vector.broadcast %cst : f32 to vector<16x128xf32>
    %7 = arith.subf %6, %5 : vector<16x128xf32>
    %8 = arith.subf %3, %4 : vector<16x128xf32>
    %9 = arith.mulf %7, %8 : vector<16x128xf32>
    %cst_6 = arith.constant 1.000000e-01 : f32
    %10 = vector.broadcast %cst_6 : f32 to vector<16x128xf32>
    %11 = arith.subf %9, %10 : vector<16x128xf32>
    %cst_7 = arith.constant 0.000000e+00 : f32
    %12 = vector.broadcast %cst_7 : f32 to vector<16x128xf32>
    %13 = arith.maximumf %11, %12 : vector<16x128xf32>
    %c1_i32 = arith.constant 1 : i32
    %14 = arith.muli %arg0, %c1_i32 : i32
    %15 = arith.addi %14, %arg1 : i32
    %c16_i32 = arith.constant 16 : i32
    %16 = arith.muli %15, %c16_i32 : i32
    %17 = tpu.iota {dimensions = array<i32: 0>} : vector<16x128xi32>
    %18 = vector.broadcast %16 : i32 to vector<16x128xi32>
    %19 = arith.addi %18, %17 : vector<16x128xi32>
    %c16_i32_8 = arith.constant 16 : i32
    %20 = vector.broadcast %c16_i32_8 : i32 to vector<16x128xi32>
    %21 = arith.cmpi slt, %19, %20 : vector<16x128xi32>
    %cst_9 = arith.constant 0.000000e+00 : f32
    %22 = vector.broadcast %cst_9 : f32 to vector<16x128xf32>
    %23 = arith.select %21, %13, %22 : vector<16x128xi1>, vector<16x128xf32>
    %24 = vector.shape_cast %23 : vector<16x128xf32> to vector<2x8x128xf32>
    %cst_10 = arith.constant dense<0.000000e+00> : vector<8x128xf32>
    %25 = vector.multi_reduction <add>, %24, %cst_10 [0] : vector<2x8x128xf32> to vector<8x128xf32>
    %c0_11 = arith.constant 0 : index
    %c0_12 = arith.constant 0 : index
    %c0_13 = arith.constant 0 : index
    %26 = vector.load %arg5[%c0_11, %c0_12, %c0_13] : memref<1x8x128xf32, #tpu.memory_space<vmem>>, vector<1x8x128xf32>
    %27 = vector.shape_cast %25 : vector<8x128xf32> to vector<1x8x128xf32>
    %28 = arith.addf %26, %27 : vector<1x8x128xf32>
    %c0_14 = arith.constant 0 : index
    %c0_15 = arith.constant 0 : index
    %c0_16 = arith.constant 0 : index
    %29 = vector.load %arg5[%c0_14, %c0_15, %c0_16] : memref<1x8x128xf32, #tpu.memory_space<vmem>>, vector<1x8x128xf32>
    tpu.vector_store %arg5[%c0_14, %c0_15, %c0_16], %28 {strides = array<i32>} : memref<1x8x128xf32, #tpu.memory_space<vmem>>, vector<1x8x128xf32>,
    return
  }
  func.func @transform_0(%arg0: i32, %arg1: i32) -> (i32, i32) {
    %c1_i32 = arith.constant 1 : i32
    %0 = arith.muli %arg0, %c1_i32 : i32
    %1 = arith.addi %0, %arg1 : i32
    %c0_i32 = arith.constant 0 : i32
    %2 = arith.minsi %1, %c0_i32 : i32
    %c0_i32_0 = arith.constant 0 : i32
    %c0_i32_1 = arith.constant 0 : i32
    return %2, %c0_i32_0 : i32, i32
  }
  func.func @transform_1(%arg0: i32, %arg1: i32) -> (i32, i32) {
    %c1_i32 = arith.constant 1 : i32
    %0 = arith.muli %arg0, %c1_i32 : i32
    %1 = arith.addi %0, %arg1 : i32
    %c0_i32 = arith.constant 0 : i32
    %2 = arith.minsi %1, %c0_i32 : i32
    %c0_i32_0 = arith.constant 0 : i32
    %c0_i32_1 = arith.constant 0 : i32
    return %2, %c0_i32_0 : i32, i32
  }
  func.func @transform_2(%arg0: i32, %arg1: i32) -> (i32, i32) {
    %c1_i32 = arith.constant 1 : i32
    %0 = arith.muli %arg0, %c1_i32 : i32
    %1 = arith.addi %0, %arg1 : i32
    %c0_i32 = arith.constant 0 : i32
    %2 = arith.minsi %1, %c0_i32 : i32
    %c0_i32_0 = arith.constant 0 : i32
    %c0_i32_1 = arith.constant 0 : i32
    return %2, %c0_i32_0 : i32, i32
  }
  func.func @transform_3(%arg0: i32, %arg1: i32) -> (i32, i32, i32) {
    %c0_i32 = arith.constant 0 : i32
    %c0_i32_0 = arith.constant 0 : i32
    %c0_i32_1 = arith.constant 0 : i32
    return %arg0, %c0_i32, %c0_i32_0 : i32, i32, i32
  }
}

</mosaic_0001>

<bundles_post_ra>
// kernel: tpu_custom_call.1
= control target key start
LH: loop header
LB: loop body
LE: loop exit
PB: predicated region body
PF: predicated region fallthrough
CT: control target
= control target key end

     0   :  { %s1049_s0 = inlined_call_operand.hbm [shape: f32[16,128], index: 0, kind: input, shape index: {}]   ;;  %s1050_s1 = inlined_call_operand.hbm [shape: f32[16,128], index: 1, kind: input, shape index: {}]   ;;  %s1051_s2 = inlined_call_operand.hbm [shape: f32[16,128], index: 2, kind: input, shape index: {}]   ;;  %s1052_s3 = inlined_call_operand.hbm [shape: f32[2,8,128], index: 3, kind: output, shape index: {}]  }
   0x1   :  { %1056 = sst [smem:[#allocation13_spill]] %s1050_s1 }
   0x2   :  { %8 = vsyncpa [#allocation3], 0 }
   0x3   :  { %10 = vsyncpa [#allocation3 + $0x1], 0 }
   0x4   :  { %11 = vsyncpa [#allocation6], 0 }
   0x5   :  { %13 = vsyncpa [#allocation6 + $0x1], 0 }
   0x6   :  { %14 = vsyncpa [#allocation4], 0 }
   0x7   :  { %16 = vsyncpa [#allocation4 + $0x1], 0  ;;  %s848_s12 = smov 0   ;;  %s850_s13 = smov 0  }
   0x8   :  { %s852_s14 = smov 0   ;;  %s854_s15 = smov 0  }
   0x9   :  { %s856_s16 = smov 0   ;;  %s858_s17 = smov 0  }
   0xa   :  { %s860_s18 = smov 0   ;;  %s862_s19 = smov 0  }
   0xb LB: > { %s887_s20 = sadd.s32 4294967295, %s821_s19   ;;  %s498_s21 = sadd.s32 4294967294, %s821_s19   ;;  %s821_s19 = sphi %s862_s19, %s22_s19   ;;  %s817_s18 = sphi %s860_s18, %s1072_s18   ;;  %s813_s17 = sphi %s858_s17, %s1071_s17   ;;  %s809_s16 = sphi %s856_s16, %s1039_s16   ;;  %s805_s15 = sphi %s854_s15, %s1070_s15   ;;  %s801_s14 = sphi %s852_s14, %s1069_s14   ;;  %s797_s13 = sphi %s850_s13, %s1068_s13   ;;  %s793_s12 = sphi %s848_s12, %s1067_s12  }
   0xc   : > { %s34_s22 = sadd.s32 1, %s817_s18  ;;  %p790_p1 = scmp.ne.s32.totalorder %s809_s16, 0 }
   0xd   : > { %p36_p0 = scmp.ge.s32.totalorder %s34_s22, 2  ;;  %p55_p2 = scmp.eq.s32.totalorder %s821_s19, 0 }
   0xe   : > { %p60_p3 = scmp.ne.s32.totalorder %s809_s16, %s805_s15  ;;  %p61_p5 = scmp.eq.s32.totalorder %s887_s20, 0 }
   0xf   : > { %s1074_s22 = smov (%p36_p0, %s34_s22), 0  ;;  %p896_p4 = por %p790_p1, %p55_p2 }
  0x10   : > { %1057 = sst [smem:[#allocation12_spill]] %s1074_s22  ;;  %p901_p6 = por %p61_p5, %p60_p3 }
  0x11   : > { %s134_s25 = ssub.s32 %s817_s18, %s1074_s22  ;;  %s137_s26 = sadd.s32 1, %s801_s14 }
  0x12   : > { %p135_p7 = scmp.eq.s32.totalorder %s134_s25, 0  ;;  %p147_p8 = scmp.ne.s32.totalorder %s801_s14, %s797_s13 }
  0x13   : > { %p148_p9 = scmp.eq.s32.totalorder %s887_s20, 1  ;;  %p153_p10 = scmp.ne.s32.totalorder %s797_s13, %s793_s12 }
  0x14   : > { %s909_s27 = scalar_select %p135_p7, %s801_s14, %s137_s26  }
  0x15   : > { %p154_p11 = scmp.eq.s32.totalorder %s498_s21, 1  ;;  %p916_p12 = por %p148_p9, %p147_p8 }
  0x16   : > { %p500_p13 = scmp.ge.s32.totalorder %s821_s19, 2  ;;  %p547_p1 = scmp.lt.s32.totalorder %s821_s19, 2 }
  0x17   : > { %p921_p0 = por %p154_p11, %p153_p10  ;;  %s199_s4 = sand.u32 1, %s821_s19  }
  0x18   : > { %p928_p2 = pnand %p547_p1, %p896_p4  ;;  %s823_s5 = smov [#allocation5]  }
  0x19   : > { %s214_s6 = sshll.u32 %s823_s5, 4  ;;  %s1063_s1 = sld [smem:[#allocation13_spill]]  ;;  %s215_s6 = int_to_ptr.vmem [resolvable:$true] %s214_s6 }
  0x1a   : > { %p510_p3 = scmp.ge.s32.totalorder %s821_s19, 1  ;;  %s937_s10 = scalar_lea.sflag [#allocation6], %s199_s4 }
  0x1b   : > { %p628_p5 = pneg %p928_p2 }
  0x1f   : > { %s212_s9 = sshll.u32 %s1063_s1, 4  ;;  %s631_s25 = scalar_lea.hbm %s1063_s1, 16  ;;  %s213_s9 = int_to_ptr.hbm [resolvable:$true] %s212_s9 }
  0x20   : > { %s624_s11 = sshra.s32 %s213_s9, 4  ;;  %s625_s11 = int_to_ptr.hbm [resolvable:$true] %s624_s11 }
  0x21   : > { %s626_s15 = scalar_lea.hbm %s625_s11, 16 }
  0x22   : > { %p627_p4 = scmp.ne.s32.totalorder %s625_s11, %s626_s15  ;;  %p633_p9 = scmp.lt.s32.totalorder %s631_s25, %s626_s15 }
  0x24   : > { %p629_p7 = pnand %p628_p5, %p627_p4 }
  0x26   : > { %p630_p8 = pneg %p629_p7 }
  0x28   : > { %p635_p10 = pnand %p633_p9, %p630_p8 }
  0x2a   : > { %638 = shalt.err (!%p635_p10)
}
  0x2b   : > { %s1053_s26 = smov 128   ;;  %s825_s4 = smov 8  }
  0x2c   : > { %539 = dma.hbm_to_vmem [thread:$0]  (!%p928_p2), %s213_s9, 256, %s215_s6, %s937_s10, %s1053_s26, %s1053_s26, %s825_s4  }
  0x2d   : > { %p247_p11 = scmp.lt.s32.totalorder %s821_s19, 3  ;;  %s826_s7 = smov [#allocation2]  }
  0x2e   : > { %s189_s8 = sshll.u32 %s826_s7, 4  ;;  %s187_s21 = sshll.u32 %s1049_s0, 4  ;;  %s190_s8 = int_to_ptr.vmem [resolvable:$true] %s189_s8  ;;  %s188_s21 = int_to_ptr.hbm [resolvable:$true] %s187_s21 }
  0x2f   : > { %p956_p1 = pnand %p510_p3, %p247_p11  ;;  %s654_s23 = sshra.s32 %s188_s21, 4  ;;  %s655_s23 = int_to_ptr.hbm [resolvable:$true] %s654_s23 }
  0x30   : > { %s656_s25 = scalar_lea.hbm %s655_s23, 16  ;;  %s661_s26 = scalar_lea.hbm %s1049_s0, 16 }
  0x31   : > { %p657_p4 = scmp.ne.s32.totalorder %s655_s23, %s656_s25  ;;  %p663_p3 = scmp.lt.s32.totalorder %s661_s26, %s656_s25 }
  0x33   : > { %p659_p7 = pnand %p657_p4, %p628_p5 }
  0x35   : > { %p660_p8 = pneg %p659_p7 }
  0x37   : > { %p665_p9 = pnand %p663_p3, %p660_p8 }
  0x39   : > { %668 = shalt.err (!%p665_p9)
}
  0x3a   : > { %s1065_s7 = smov 128   ;;  %s827_s11 = smov [#allocation7]  }
  0x3b   : > { %536 = dma.hbm_to_vmem [thread:$0]  (!%p928_p2), %s188_s21, 256, %s190_s8, [#allocation3], %s1065_s7, %s1065_s7, %s825_s4  }
  0x3c   : > { %s239_s15 = sshll.u32 %s827_s11, 4  ;;  %s237_s22 = sshll.u32 %s1051_s2, 4  ;;  %s240_s15 = int_to_ptr.vmem [resolvable:$true] %s239_s15  ;;  %s238_s22 = int_to_ptr.hbm [resolvable:$true] %s237_s22 }
  0x3d   : > { %s684_s6 = sshra.s32 %s238_s22, 4  ;;  %s691_s8 = scalar_lea.hbm %s1051_s2, 16  ;;  %s685_s6 = int_to_ptr.hbm [resolvable:$true] %s684_s6 }
  0x3e   : > { %s686_s26 = scalar_lea.hbm %s685_s6, 16 }
  0x3f   : > { %p687_p10 = scmp.ne.s32.totalorder %s685_s6, %s686_s26  ;;  %p693_p7 = scmp.lt.s32.totalorder %s691_s8, %s686_s26 }
  0x41   : > { %p689_p11 = pnand %p687_p10, %p628_p5 }
  0x43   : > { %p690_p4 = pneg %p689_p11 }
  0x45   : > { %p695_p8 = pnand %p693_p7, %p690_p4 }
  0x47   : > { %698 = shalt.err (!%p695_p8)
}
  0x48   : > { %542 = dma.hbm_to_vmem [thread:$0]  (!%p928_p2), %s238_s22, 256, %s240_s15, %s937_s10, %s1065_s7, %s1065_s7, %s825_s4  }
  0x49   : > { %251 = sbr.rel (%p956_p1) target bundleno = 99 (0x63), region = 32  ;;  %s253_s1 = sand.u32 (!%p956_p1), 1, %s809_s16  }
  0x4a   : > { %s511_s21 = sshll.u32 (!%p956_p1), %s253_s1, 4  ;;  %s254_s11 = scalar_lea.sflag (!%p956_p1), [#allocation3], %s253_s1 }
  0x4b   : > { %s257_s23 = scalar_lea.vmem (!%p956_p1), [#allocation2], %s511_s21 }
  0x4e   : > { %779 = dma.done.wait (%p901_p6), %s254_s11, 256  }
  0x4f   : > { %781 = vsyncadd (%p901_p6), %s254_s11, 4294967040  ;;  %s263_s30 = sand.u32 1, %s887_s20   ;;  %s267_s26 = scalar_lea.vmem [#allocation5], %s511_s21 }
  0x50   : > { %s264_s6 = scalar_lea.sflag [#allocation6], %s263_s30 }
  0x51   : > { %783 = dma.done.wait (%p901_p6), %s264_s6, 512  }
  0x52   : > { %785 = vsyncadd (%p901_p6), %s264_s6, 4294966784  ;;  %v346_v0 = vlaneseq  ;;  %s517_s22 = sshll.u32 %s813_s17, 4  ;;  %v328_v3 = vld [vmem:[%s257_s23] sm:$0xff]  ;;  %v329_v4 = vld [vmem:[%s257_s23 + $0x8] sm:$0xff]  ;;  %s308_s20 = sand.u32 1, %s797_s13  }
  0x53   : > { %v330_v5 = vld [vmem:[%s267_s26] sm:$0xff]  ;;  %v349_v6 = vstv %s517_s22  ;;  %v331_v7 = vld [vmem:[%s267_s26 + $0x8] sm:$0xff]  ;;  %s277_s10 = scalar_lea.vmem [#allocation7], %s511_s21  ;;  %s514_s24 = sshll.u32 %s308_s20, 3 }
  0x54   : > { %v347_v1 = vshrl.u32 %v346_v0, 7  ;;  %v332_v8 = vld [vmem:[%s277_s10] sm:$0xff]  ;;  %v333_v9 = vld [vmem:[%s277_s10 + $0x8] sm:$0xff]  ;;  %v336_v10 = vsub.f32 %v328_v3, %v330_v5  ;;  %v337_v13 = vsub.f32 %v329_v4, %v331_v7  ;;  %s519_s4 = sshll.u32 %s813_s17, 3  ;;  %s310_s25 = scalar_lea.vmem [#allocation8], %s514_s24 }
  0x55   : > { %v334_v11 = vsub.f32 0.0, %v332_v8  ;;  %v335_v12 = vsub.f32 0.0, %v333_v9  ;;  %s371_s15 = scalar_lea.hbm %s1052_s3, %s519_s4  ;;  %s373_s9 = sshll.u32 %s310_s25, 4  ;;  %s374_s9 = int_to_ptr.vmem [resolvable:$true] %s373_s9 }
  0x56   : > { %v348_v2 = vadd.s32 8, %v347_v1  ;;  %v350_v14 = vadd.s32 %v349_v6, %v347_v1  ;;  %s375_s8 = sshll.u32 %s371_s15, 4  ;;  %s361_s17 = scalar_lea.sflag [#allocation4], %s308_s20  ;;  %s376_s8 = int_to_ptr.hbm [resolvable:$true] %s375_s8 }
  0x57   : > { %v338_v16 = vmul.f32 %v336_v10, %v334_v11  ;;  %v339_v17 = vmul.f32 %v337_v13, %v335_v12  ;;  %s728_s1 = sshra.s32 %s376_s8, 4  ;;  %s734_s30 = scalar_lea.hbm %s1052_s3, 16  ;;  %s729_s1 = int_to_ptr.hbm [resolvable:$true] %s728_s1 }
  0x58   : > { %v351_v15 = vadd.s32 %v349_v6, %v348_v2  ;;  %vm352_vm0 = vcmp.lt.s32.totalorder %v350_v14, 16  ;;  %s730_s21 = scalar_lea.hbm %s729_s1, 8  ;;  %p735_p1 = scmp.lt.s32.totalorder %s729_s1, %s1052_s3 }
  0x59   : > { %v515_v18 = vadd.f32 -0.1, %v338_v16  ;;  %v516_v19 = vadd.f32 -0.1, %v339_v17  ;;  %p731_p6 = scmp.ne.s32.totalorder %s729_s1, %s730_s21  ;;  %p736_p3 = scmp.lt.s32.totalorder %s734_s30, %s730_s21 }
  0x5a   : > { %vm353_vm1 = vcmp.lt.s32.totalorder %v351_v15, 16 }
  0x5b   : > { %v342_v20 = vmax.f32 %v515_v18, 0.0  ;;  %v343_v21 = vmax.f32 %v516_v19, 0.0  ;;  %p732_p2 = pnand %p731_p6, %p916_p12  ;;  %p737_p9 = por %p736_p3, %p735_p1 }
  0x5d   : > { %v354_v22 = vsel %vm352_vm0, %v342_v20, 0.0  ;;  %v355_v23 = vsel %vm353_vm1, %v343_v21, 0.0  ;;  %p733_p5 = pneg %p732_p2 }
  0x5e   : > { %v356_v24 = vadd.f32 %v355_v23, %v354_v22 }
  0x5f   : > { %p738_p10 = pnand %p737_p9, %p733_p5 }
  0x60   : > { %359 = vst [vmem:[%s310_s25] sm:$0xff] %v356_v24 }
  0x61   : > { %741 = shalt.err (!%p738_p10)
}
  0x62   : > { %531 = dma.vmem_to_hbm [thread:$0]  (%p916_p12), %s374_s9, 128, %s376_s8, %s361_s17  }
  0x63 PF: > { %s387_s22 = sand.u32 1, %s793_s12   ;;  %p544_p11 = pnand %p500_p13, %p921_p0 }
  0x64   : > { %s388_s20 = scalar_lea.sflag [#allocation4], %s387_s22 }
  0x65   : > { %p545_p4 = pneg %p544_p11 }
  0x67   : > { %787 = dma.done.wait (%p545_p4), %s388_s20, 128  }
  0x68   : > { %789 = vsyncadd (%p545_p4), %s388_s20, 4294967168  ;;  %s22_s19 = sadd.s32 1, %s821_s19   ;;  %s1066_s28 = sld [smem:[#allocation12_spill]] }
  0x69   : > { %p19_p7 = scmp.ge.s32.totalorder %s22_s19, 4   ;;  %s1067_s12 = smov %s797_s13 }
  0x6a   : > { %s1068_s13 = smov %s801_s14  ;;  %s1069_s14 = smov %s909_s27 }
  0x6b   : > { %s1070_s15 = smov %s809_s16  ;;  %s1039_s16 = smov 0  }
  0x6c   : > { %s1071_s17 = smov %s817_s18  ;;  %21 = sbr.rel (!%p19_p7) target bundleno = 11 (0xb), region = 105 }
  0x6e   : > { %s1072_s18 = smov %s1066_s28 }
  0x71   :  { %394 = vsyncpa [#allocation3], 1 }
  0x72   :  { %396 = vsyncpa [#allocation3 + $0x1], 1 }
  0x73   :  { %397 = vsyncpa [#allocation6], 1 }
  0x74   :  { %399 = vsyncpa [#allocation6 + $0x1], 1 }
  0x75   :  { %400 = vsyncpa [#allocation4], 1 }
  0x76   :  { %402 = vsyncpa [#allocation4 + $0x1], 1 }

</bundles_post_ra>
